<compile_context>
chip_gen: v6e
topology: v6e:2x2x1
jax: 0.10.0
libtpu: 0.0.40
codegen_flags: <defaults>
</compile_context>

<pallas_src>
import functools

import jax
import jax.numpy as jnp
from jax.experimental import pallas as pl
from jax.experimental.pallas import tpu as pltpu


def _round_up(a: int, b: int) -> int:
    return (a + b - 1) // b * b


@functools.lru_cache(maxsize=1)
def _vmem_capacity_bytes() -> int:
    """Per-TensorCore VMEM capacity; conservative fallback if query unavailable."""
    try:
        info = pltpu.get_tpu_info()
        cap = getattr(info, "vmem_capacity_bytes", None)
        if cap:
            return int(cap)
    except Exception:
        pass
    return 64 << 20  # v7x per-TC VMEM (the smallest current generation)


# ---------------------------------------------------------------------------
# Kernel: one batch tile, whole (padded) in/hidden/out dims resident in VMEM.
# ---------------------------------------------------------------------------
def _mlp_kernel(x_ref, w1_ref, b1_ref, w2_ref, b2_ref, o_ref):
    # Layer 1: bf16 MXU matmul, f32 accumulation; bias + tanh in f32 (EUP).
    x = x_ref[...].astype(w1_ref.dtype)          # no-op if x already bf16
    h = jnp.dot(x, w1_ref[...], preferred_element_type=jnp.float32)
    h = jnp.tanh(h + b1_ref[...])                # b1 is (1, hid_pad) -> broadcasts
    # Layer 2: cast activations back to bf16 for the MXU, accumulate in f32.
    y = jnp.dot(h.astype(w2_ref.dtype), w2_ref[...],
                preferred_element_type=jnp.float32)
    o_ref[...] = (y + b2_ref[...]).astype(o_ref.dtype)


# ---------------------------------------------------------------------------
# One-time parameter preparation (call at model init, NOT per forward).
# ---------------------------------------------------------------------------
def prepare_params(w1, b1, w2, b2):
    """Pad all lane dims to multiples of 128 and cast weights to bf16.

    w1: [in_features, hidden]   b1: [hidden] or [1, hidden]
    w2: [hidden, out_features]  b2: [out_features] or [1, out_features]
    """
    in_f, hidden = w1.shape
    out_f = w2.shape[1]
    in_pad = _round_up(in_f, 128)
    hid_pad = _round_up(hidden, 128)
    out_pad = _round_up(out_f, 128)

    w1_p = jnp.pad(w1.astype(jnp.bfloat16),
                   ((0, in_pad - in_f), (0, hid_pad - hidden)))
    b1_p = jnp.pad(b1.astype(jnp.float32).reshape(1, -1),
                   ((0, 0), (0, hid_pad - hidden)))
    w2_p = jnp.pad(w2.astype(jnp.bfloat16),
                   ((0, hid_pad - hidden), (0, out_pad - out_f)))
    b2_p = jnp.pad(b2.astype(jnp.float32).reshape(1, -1),
                   ((0, 0), (0, out_pad - out_f)))

    return {"w1": w1_p, "b1": b1_p, "w2": w2_p, "b2": b2_p,
            "in_features": int(in_f), "out_features": int(out_f)}


# ---------------------------------------------------------------------------
# Jitted forward on pre-padded params.
# ---------------------------------------------------------------------------
@functools.partial(jax.jit,
                   static_argnames=("out_features", "block_m", "out_dtype"))
def _forward_padded(x, w1_p, b1_p, w2_p, b2_p, *, out_features,
                    block_m=None, out_dtype=jnp.float32):
    B, in_f = x.shape
    in_pad, hid_pad = w1_p.shape
    out_pad = w2_p.shape[1]

    # --- generation-aware tiling / VMEM budget (all trace-time Python) -------
    vmem_cap = _vmem_capacity_bytes()
    big_vmem = vmem_cap >= (96 << 20)            # v5e / v6e (128 MiB) vs v7x (64 MiB)
    if block_m is None:
        block_m = 512 if big_vmem else 256       # larger tiles amortize per-step overhead
    block_m = max(16, _round_up(block_m, 16))

    # Batch tile: multiple of 16 (bf16 sublane packing); MXU-aligned block_m
    # for large B; for small B a single tile that just covers the batch.
    tm = min(block_m, _round_up(B, 16))
    grid = (pl.cdiv(B, tm),)                     # partial last block handled by Pallas

    # --- activation prep: only repack x when the lane dim needs padding ------
    if in_pad != in_f:
        x_p = jnp.pad(x.astype(jnp.bfloat16), ((0, 0), (0, in_pad - in_f)))
    else:
        x_p = x                                  # stream as-is; kernel casts in VMEM
    x_item = x_p.dtype.itemsize
    out_item = jnp.dtype(out_dtype).itemsize

    # --- VMEM estimate (lane/sublane padded) ----------------------------------
    def _tile_bytes(rows, cols, itemsize):
        return _round_up(rows, 8) * _round_up(cols, 128) * itemsize

    weight_bytes = (_tile_bytes(in_pad, hid_pad, 2)       # w1 (bf16)
                    + _tile_bytes(hid_pad, out_pad, 2)    # w2 (bf16)
                    + _tile_bytes(1, hid_pad, 4)          # b1 (f32)
                    + _tile_bytes(1, out_pad, 4))         # b2 (f32)
    stream_bytes = (_tile_bytes(tm, in_pad, x_item)       # x tile
                    + _tile_bytes(tm, out_pad, out_item)) # out tile
    interm_bytes = (_tile_bytes(tm, hid_pad, 4)           # h (f32)
                    + _tile_bytes(tm, hid_pad, 2)         # h (bf16 for 2nd matmul)
                    + _tile_bytes(tm, out_pad, 4))        # y (f32)
    # Streamed tiles are double-buffered; count resident weights x2 as well in
    # case the pipeliner does not collapse constant-index blocks.
    vmem_est = 2 * weight_bytes + 2 * stream_bytes + interm_bytes
    vmem_limit = min(max(vmem_est + (4 << 20), 16 << 20), vmem_cap * 3 // 4)
    # TODO(synk): when resident weights exceed the budget (large hidden/out on
    # v7x's 64 MiB), add a fallback that streams w2 over an N grid axis or
    # K-tiles hidden with an f32 accumulator scratch + pl.when init/finalize.

    n_rows = grid[0] * tm
    cost = pl.CostEstimate(
        flops=2 * n_rows * (in_pad * hid_pad + hid_pad * out_pad),
        transcendentals=n_rows * hid_pad,
        bytes_accessed=(x_p.size * x_item
                        + w1_p.size * 2 + w2_p.size * 2
                        + b1_p.size * 4 + b2_p.size * 4
                        + B * out_pad * out_item),
    )

    out = pl.pallas_call(
        _mlp_kernel,
        out_shape=jax.ShapeDtypeStruct((B, out_pad), out_dtype),
        grid=grid,
        in_specs=[
            pl.BlockSpec((tm, in_pad), lambda i: (i, 0)),        # x: streamed over batch
            pl.BlockSpec((in_pad, hid_pad), lambda i: (0, 0)),   # w1: VMEM-resident
            pl.BlockSpec((1, hid_pad), lambda i: (0, 0)),        # b1: VMEM-resident
            pl.BlockSpec((hid_pad, out_pad), lambda i: (0, 0)),  # w2: VMEM-resident
            pl.BlockSpec((1, out_pad), lambda i: (0, 0)),        # b2: VMEM-resident
        ],
        out_specs=pl.BlockSpec((tm, out_pad), lambda i: (i, 0)),
        compiler_params=pltpu.CompilerParams(
            dimension_semantics=("parallel",),   # megacore sharding on v7x
            vmem_limit_bytes=int(vmem_limit),
        ),
        cost_estimate=cost,
    )(x_p, w1_p, b1_p, w2_p, b2_p)

    return out[:, :out_features]


def img2word_forward(x, params, *, block_m=None, out_dtype=jnp.float32):
    """x: [B, in_features]; params from prepare_params() -> [B, out_features]."""
    return _forward_padded(x, params["w1"], params["b1"], params["w2"],
                           params["b2"], out_features=params["out_features"],
                           block_m=block_m, out_dtype=out_dtype)


# ---------------------------------------------------------------------------
# Demo / correctness check.
# ---------------------------------------------------------------------------
def _torch_linear_init(key, fan_in, fan_out):
    """Deterministic init mimicking nn.Linear default U(-1/sqrt(fan_in), ...).
    Weight returned in [fan_in, fan_out] layout (pre-transposed), bias [1, fan_out]."""
    kw, kb = jax.random.split(key)
    bound = 1.0 / jnp.sqrt(jnp.float32(fan_in))
    w = jax.random.uniform(kw, (fan_in, fan_out), jnp.float32, -bound, bound)
    b = jax.random.uniform(kb, (1, fan_out), jnp.float32, -bound, bound)
    return w, b


if __name__ == "__main__":
    # Small shapes consistent with the module's forward: X: [batch, in_features].
    batch, in_features, hidden_size, out_features = 16, 16, 32, 16

    key = jax.random.PRNGKey(0)
    k_x, k_l1, k_l2 = jax.random.split(key, 3)

    x = jax.random.normal(k_x, (batch, in_features), jnp.float32)
    w1, b1 = _torch_linear_init(k_l1, in_features, hidden_size)
    w2, b2 = _torch_linear_init(k_l2, hidden_size, out_features)

    params = prepare_params(w1, b1, w2, b2)      # one-time weight pad/cast
    y = img2word_forward(x, params)
    jax.block_until_ready(y)

    # Reference check in plain JAX f32 (same math as the PyTorch forward).
    # Tolerance loosened: bf16 MXU inputs (f32 accumulation) -> ~1e-2 relative.
    y_ref = jnp.tanh(x @ w1 + b1) @ w2 + b2
    assert y.shape == (batch, out_features)
    assert y.dtype == jnp.float32
    assert jnp.allclose(y, y_ref, atol=5e-2, rtol=5e-2), (
        float(jnp.max(jnp.abs(y - y_ref))))

    print("KERNEL_OK")
</pallas_src>

<mosaic_0001>
module attributes {stable_mosaic.version = 11 : i64} {
  func.func @_mlp_kernel(%arg0: i32, %arg1: memref<16x128xbf16, #tpu.memory_space<vmem>>, %arg2: memref<128x128xbf16, #tpu.memory_space<vmem>>, %arg3: memref<1x128xf32, #tpu.memory_space<vmem>>, %arg4: memref<128x128xbf16, #tpu.memory_space<vmem>>, %arg5: memref<1x128xf32, #tpu.memory_space<vmem>>, %arg6: memref<16x128xf32, #tpu.memory_space<vmem>>) attributes {dimension_semantics = [#tpu.dimension_semantics<parallel>], iteration_bounds = array<i64: 1>, scalar_prefetch = 0 : i64, scratch_operands = 0 : i64, tpu.core_type = #tpu.core_type<tc>, window_params = [{transform_indices = @transform_0, window_bounds = array<i64: 16, 128>}, {pipeline_mode = #tpu.pipeline_mode<synchronous>, transform_indices = @transform_1, window_bounds = array<i64: 128, 128>}, {pipeline_mode = #tpu.pipeline_mode<synchronous>, transform_indices = @transform_2, window_bounds = array<i64: 1, 128>}, {pipeline_mode = #tpu.pipeline_mode<synchronous>, transform_indices = @transform_3, window_bounds = array<i64: 128, 128>}, {pipeline_mode = #tpu.pipeline_mode<synchronous>, transform_indices = @transform_4, window_bounds = array<i64: 1, 128>}, {transform_indices = @transform_5, window_bounds = array<i64: 16, 128>}]} {
    %c0 = arith.constant 0 : index
    %c0_0 = arith.constant 0 : index
    %0 = vector.load %arg1[%c0, %c0_0] : memref<16x128xbf16, #tpu.memory_space<vmem>>, vector<16x128xbf16>
    %c0_1 = arith.constant 0 : index
    %c0_2 = arith.constant 0 : index
    %1 = vector.load %arg2[%c0_1, %c0_2] : memref<128x128xbf16, #tpu.memory_space<vmem>>, vector<128x128xbf16>
    %cst = arith.constant dense<0.000000e+00> : vector<16x128xf32>
    %2 = tpu.matmul %0, %1, %cst {dimension_numbers = #tpu.dot_dimension_numbers<[1], [0], [0], [1], [0, 0, 1, 1], [], []>} : vector<16x128xbf16>, vector<128x128xbf16>, vector<16x128xf32> -> vector<16x128xf32>
    %c0_3 = arith.constant 0 : index
    %c0_4 = arith.constant 0 : index
    %3 = vector.load %arg3[%c0_3, %c0_4] : memref<1x128xf32, #tpu.memory_space<vmem>>, vector<1x128xf32>
    %4 = vector.broadcast %3 : vector<1x128xf32> to vector<16x128xf32>
    %5 = arith.addf %2, %4 : vector<16x128xf32>
    %6 = math.tanh %5 : vector<16x128xf32>
    %7 = arith.truncf %6 : vector<16x128xf32> to vector<16x128xbf16>
    %c0_5 = arith.constant 0 : index
    %c0_6 = arith.constant 0 : index
    %8 = vector.load %arg4[%c0_5, %c0_6] : memref<128x128xbf16, #tpu.memory_space<vmem>>, vector<128x128xbf16>
    %cst_7 = arith.constant dense<0.000000e+00> : vector<16x128xf32>
    %9 = tpu.matmul %7, %8, %cst_7 {dimension_numbers = #tpu.dot_dimension_numbers<[1], [0], [0], [1], [0, 0, 1, 1], [], []>} : vector<16x128xbf16>, vector<128x128xbf16>, vector<16x128xf32> -> vector<16x128xf32>
    %c0_8 = arith.constant 0 : index
    %c0_9 = arith.constant 0 : index
    %10 = vector.load %arg5[%c0_8, %c0_9] : memref<1x128xf32, #tpu.memory_space<vmem>>, vector<1x128xf32>
    %11 = vector.broadcast %10 : vector<1x128xf32> to vector<16x128xf32>
    %12 = arith.addf %9, %11 : vector<16x128xf32>
    %c0_10 = arith.constant 0 : index
    %c0_11 = arith.constant 0 : index
    %13 = vector.load %arg6[%c0_10, %c0_11] : memref<16x128xf32, #tpu.memory_space<vmem>>, vector<16x128xf32>
    tpu.vector_store %arg6[%c0_10, %c0_11], %12 {strides = array<i32>} : memref<16x128xf32, #tpu.memory_space<vmem>>, vector<16x128xf32>,
    return
  }
  func.func @transform_0(%arg0: i32) -> (i32, i32) {
    %c0_i32 = arith.constant 0 : i32
    %c0_i32_0 = arith.constant 0 : i32
    return %arg0, %c0_i32 : i32, i32
  }
  func.func @transform_1(%arg0: i32) -> (i32, i32) {
    %c0_i32 = arith.constant 0 : i32
    %c0_i32_0 = arith.constant 0 : i32
    %c0_i32_1 = arith.constant 0 : i32
    return %c0_i32, %c0_i32_0 : i32, i32
  }
  func.func @transform_2(%arg0: i32) -> (i32, i32) {
    %c0_i32 = arith.constant 0 : i32
    %c0_i32_0 = arith.constant 0 : i32
    %c0_i32_1 = arith.constant 0 : i32
    return %c0_i32, %c0_i32_0 : i32, i32
  }
  func.func @transform_3(%arg0: i32) -> (i32, i32) {
    %c0_i32 = arith.constant 0 : i32
    %c0_i32_0 = arith.constant 0 : i32
    %c0_i32_1 = arith.constant 0 : i32
    return %c0_i32, %c0_i32_0 : i32, i32
  }
  func.func @transform_4(%arg0: i32) -> (i32, i32) {
    %c0_i32 = arith.constant 0 : i32
    %c0_i32_0 = arith.constant 0 : i32
    %c0_i32_1 = arith.constant 0 : i32
    return %c0_i32, %c0_i32_0 : i32, i32
  }
  func.func @transform_5(%arg0: i32) -> (i32, i32) {
    %c0_i32 = arith.constant 0 : i32
    %c0_i32_0 = arith.constant 0 : i32
    return %arg0, %c0_i32 : i32, i32
  }
}

</mosaic_0001>

<bundles_post_ra>
// kernel: _forward_padded.1
= control target key start
LH: loop header
LB: loop body
LE: loop exit
PB: predicated region body
PF: predicated region fallthrough
CT: control target
= control target key end

     0   :  { %10 = vsyncpa [#allocation3], 0  ;;  %s535_s0 = inlined_call_operand.vmem [shape: bf16[16,128], index: 0, kind: input, shape index: {}]   ;;  %s536_s1 = inlined_call_operand.hbm [shape: bf16[128,128], index: 1, kind: input, shape index: {}]   ;;  %s537_s2 = inlined_call_operand.vmem [shape: f32[1,128], index: 2, kind: input, shape index: {}]   ;;  %s538_s3 = inlined_call_operand.hbm [shape: bf16[128,128], index: 3, kind: input, shape index: {}]   ;;  %s539_s4 = inlined_call_operand.vmem [shape: f32[1,128], index: 4, kind: input, shape index: {}]   ;;  %s540_s5 = inlined_call_operand.hbm [shape: f32[16,128], index: 5, kind: output, shape index: {}]  }
   0x1   :  { %11 = vsyncpa [#allocation6], 0 }
   0x2   :  { %12 = vsyncpa [#allocation4], 0  ;;  %s478_s18 = smov [#allocation2]  }
   0x3   :  { %s20_s19 = sshll.u32 %s478_s18, 4  ;;  %s21_s19 = int_to_ptr.vmem [resolvable:$true] %s20_s19 }
   0x4   :  { %s420_s20 = scalar_lea.vmem %s21_s19, 1024  ;;  %p425_p1 = scmp.lt.s32.totalorder %s21_s19, %s21_s19 }
   0x5   :  { %p421_p0 = scmp.ne.s32.totalorder %s21_s19, %s420_s20  ;;  %p426_p2 = scmp.lt.s32.totalorder %s420_s20, %s420_s20 }
   0x7   :  { %p427_p3 = por %p426_p2, %p425_p1 }
   0x9   :  { %p428_p4 = pnand %p427_p3, %p421_p0 }
   0xb   :  { %431 = shalt.err (!%p428_p4)
}
   0xc   :  { %s479_s21 = smov 64   ;;  %s480_s22 = smov 4  }
   0xd   :  { %26 = dma.hbm_to_vmem [thread:$0]  %s536_s1, 1024, %s21_s19, [#allocation3], %s479_s21, %s479_s21, %s480_s22  }
   0xe   :  { %s481_s25 = smov [#allocation5]  }
   0xf   :  { %s34_s26 = sshll.u32 %s481_s25, 4  ;;  %s35_s26 = int_to_ptr.vmem [resolvable:$true] %s34_s26 }
  0x10   :  { %s440_s27 = scalar_lea.vmem %s35_s26, 1024  ;;  %p445_p6 = scmp.lt.s32.totalorder %s35_s26, %s35_s26 }
  0x11   :  { %p441_p5 = scmp.ne.s32.totalorder %s35_s26, %s440_s27  ;;  %p446_p7 = scmp.lt.s32.totalorder %s440_s27, %s440_s27 }
  0x13   :  { %p447_p8 = por %p446_p7, %p445_p6 }
  0x15   :  { %p448_p9 = pnand %p447_p8, %p441_p5 }
  0x17   :  { %451 = shalt.err (!%p448_p9)
}
  0x18   :  { %40 = dma.hbm_to_vmem [thread:$0]  %s538_s3, 1024, %s35_s26, [#allocation6], %s479_s21, %s479_s21, %s480_s22  }
  0x19   :  { %472 = dma.done.wait [#allocation3], 1024  }
  0x1a   :  { %473 = vsyncadd [#allocation3], 4294966272 }
  0x1b   :  { %474 = dma.done.wait [#allocation6], 1024  }
  0x1c   :  { %475 = vsyncadd [#allocation6], 4294966272  ;;  %v482_v0 = vmov 0.0   ;;  %vm483_vm0 = vmmov 0   ;;  %v391_v1 = vld [vmem:[#allocation2 + $0x38] sm:$0xff]   ;;  %v392_v2 = vld [vmem:[#allocation2 + $0x30] sm:$0xff]  }
  0x1d   :  { %342 = vmatprep.subr.bf16.mxu0 %v482_v0  ;;  %358 = vmatprep.mubr.msk.bf16.mxu0 %vm483_vm0, %v482_v0  ;;  %v393_v3 = vld [vmem:[#allocation2 + $0x28] sm:$0xff]   ;;  %v400_v4 = vld [vmem:[#allocation5 + $0x38] sm:$0xff]   ;;  %v394_v5 = vld [vmem:[#allocation2 + $0x20] sm:$0xff]   ;;  %s484_s8 = smov [#allocation7]  }
  0x1e   :  { %362 = vmatprep.subr.bf16.mxu1 %v482_v0  ;;  %378 = vmatprep.mubr.msk.bf16.mxu1 %vm483_vm0, %v482_v0  ;;  %v401_v6 = vld [vmem:[#allocation5 + $0x30] sm:$0xff]   ;;  %v395_v7 = vld [vmem:[#allocation2 + $0x18] sm:$0xff]   ;;  %v397_v9 = vld [vmem:[#allocation2 + $0x8] sm:$0xff]  }
  0x1f   :  { %343 = vmatpush3.bf16.msra.mxu0 %v391_v1  ;;  %363 = vmatpush3.bf16.msra.mxu1 %v400_v4  ;;  %v396_v8 = vld [vmem:[#allocation2 + $0x10] sm:$0xff]   ;;  %v398_v10 = vld [vmem:[#allocation2] sm:$0xff]   ;;  %v402_v12 = vld [vmem:[#allocation5 + $0x28] sm:$0xff]  }
  0x20   :  { %344 = vmatprep.subr.bf16.mxu0 %v482_v0  ;;  %364 = vmatprep.subr.bf16.mxu1 %v482_v0  ;;  %v399_v11 = vld [vmem:[%s535_s0] sm:$0xff]   ;;  %v404_v14 = vld [vmem:[#allocation5 + $0x18] sm:$0xff]   ;;  %v405_v15 = vld [vmem:[#allocation5 + $0x10] sm:$0xff]  }
  0x21   :  { %v403_v13 = vld [vmem:[#allocation5 + $0x20] sm:$0xff]   ;;  %v406_v16 = vld [vmem:[#allocation5 + $0x8] sm:$0xff]  }
  0x22   :  { %v407_v17 = vld [vmem:[#allocation5] sm:$0xff]  }
  0x23   :  { %345 = vmatpush3.bf16.msra.mxu0 %v392_v2  ;;  %365 = vmatpush3.bf16.msra.mxu1 %v401_v6  ;;  %v305_v18 = vld [vmem:[%s537_s2] ss:$0 sm:$0xff]  ;;  %s292_s2 = sshll.u32 %s484_s8, 4  ;;  %s293_s2 = int_to_ptr.vmem [resolvable:$true] %s292_s2 }
  0x24   :  { %346 = vmatprep.subr.bf16.mxu0 %v482_v0  ;;  %366 = vmatprep.subr.bf16.mxu1 %v482_v0  ;;  %v315_v28 = vld [vmem:[%s539_s4] ss:$0 sm:$0xff]  ;;  %s452_s9 = scalar_lea.vmem %s293_s2, 256  ;;  %p457_p11 = scmp.lt.s32.totalorder %s293_s2, %s293_s2 }
  0x25   :  { %p453_p10 = scmp.ne.s32.totalorder %s293_s2, %s452_s9  ;;  %p458_p12 = scmp.lt.s32.totalorder %s452_s9, %s452_s9 }
  0x27   :  { %347 = vmatpush3.bf16.msra.mxu0 %v393_v3  ;;  %367 = vmatpush3.bf16.msra.mxu1 %v402_v12  ;;  %p459_p13 = por %p458_p12, %p457_p11 }
  0x28   :  { %348 = vmatprep.subr.bf16.mxu0 %v482_v0  ;;  %368 = vmatprep.subr.bf16.mxu1 %v482_v0 }
  0x29   :  { %p460_p0 = pnand %p459_p13, %p453_p10 }
  0x2b   :  { %349 = vmatpush3.bf16.msra.mxu0 %v394_v5  ;;  %369 = vmatpush3.bf16.msra.mxu1 %v403_v13 }
  0x2c   :  { %350 = vmatprep.subr.bf16.mxu0 %v482_v0  ;;  %370 = vmatprep.subr.bf16.mxu1 %v482_v0 }
  0x2f   :  { %351 = vmatpush3.bf16.msra.mxu0 %v395_v7  ;;  %371 = vmatpush3.bf16.msra.mxu1 %v404_v14 }
  0x30   :  { %352 = vmatprep.subr.bf16.mxu0 %v482_v0  ;;  %372 = vmatprep.subr.bf16.mxu1 %v482_v0 }
  0x33   :  { %353 = vmatpush3.bf16.msra.mxu0 %v396_v8  ;;  %373 = vmatpush3.bf16.msra.mxu1 %v405_v15 }
  0x34   :  { %354 = vmatprep.subr.bf16.mxu0 %v482_v0  ;;  %374 = vmatprep.subr.bf16.mxu1 %v482_v0 }
  0x37   :  { %355 = vmatpush3.bf16.msra.mxu0 %v397_v9  ;;  %375 = vmatpush3.bf16.msra.mxu1 %v406_v16 }
  0x38   :  { %356 = vmatprep.subr.bf16.mxu0 %v482_v0  ;;  %376 = vmatprep.subr.bf16.mxu1 %v482_v0 }
  0x3b   :  { %357 = vmatpush3.bf16.msra.mxu0 %v398_v10  ;;  %377 = vmatpush3.bf16.msra.mxu1 %v407_v17 }
  0x3e   :  { %359 = vmatmul.mubr.bf16.vlgmr.msra.gmra.mxu0 %v399_v11 }
  0xfe   :  { %v163_v19 = vpop.f32.mrf.mxu0 }
  0xff   :  { %v164_v20 = vadd.f32 %v305_v18, %v163_v19 }
 0x100   :  { %v360_v21 = vpop.f32.mrf.mxu0 }
 0x101   :  { %408 = vtanh.f32 %v164_v20 }
 0x102   :  { %v166_v22 = vpop.f32.mrf.mxu0 }
 0x103   :  { %v167_v23 = vadd.f32 %v305_v18, %v166_v22 }
 0x104   :  { %v361_v24 = vpop.f32.mrf.mxu0 }
 0x105   :  { %410 = vtanh.f32 %v167_v23 }
 0x10e   :  { %v409_v25 = vpop.eup %408 }
 0x112   :  { %v411_v26 = vpop.eup %410 }
 0x113   :  { %v172_v27 = vpack.c.bf16 %v411_v26, %v409_v25 }
 0x115   :  { %379 = vmatmul.mubr.bf16.vlgmr.msra.gmra.mxu1 %v172_v27 }
 0x1d5   :  { %v278_v29 = vpop.f32.mrf.mxu1 }
 0x1d6   :  { %v279_v30 = vadd.f32 %v315_v28, %v278_v29 }
 0x1d7   :  { %v380_v31 = vpop.f32.mrf.mxu1 }
 0x1d8   :  { %285 = vst [vmem:[#allocation7] sm:$0xff] %v279_v30 }
 0x1d9   :  { %v281_v32 = vpop.f32.mrf.mxu1 }
 0x1da   :  { %v282_v33 = vadd.f32 %v315_v28, %v281_v32 }
 0x1db   :  { %v381_v34 = vpop.f32.mrf.mxu1 }
 0x1dc   :  { %286 = vst [vmem:[#allocation7 + $0x8] sm:$0xff] %v282_v33 }
 0x1dd   :  { %463 = shalt.err (!%p460_p0)
}
 0x1de   :  { %s485_s10 = smov 128   ;;  %s486_s4 = smov 8  }
 0x1df   :  { %298 = dma.vmem_to_hbm [thread:$0]  %s293_s2, 256, %s540_s5, [#allocation4], %s485_s10, %s485_s10, %s486_s4  }
 0x1e0   :  { %476 = dma.done.wait [#allocation4], 256  }
 0x1e1   :  { %477 = vsyncadd [#allocation4], 4294967040 }
 0x1e2   :  { %302 = vsyncpa [#allocation3], 1 }
 0x1e3   :  { %303 = vsyncpa [#allocation6], 1 }
 0x1e4   :  { %304 = vsyncpa [#allocation4], 1 }

</bundles_post_ra>
